<compile_context>
chip_gen: v5e
topology: v5e:2x2
jax: 0.10.0
libtpu: 0.0.40
codegen_flags: <defaults>
</compile_context>

<pallas_src>
import functools

import jax
import jax.numpy as jnp
from jax.experimental import pallas as pl
from jax.experimental.pallas import tpu as pltpu


def _cdiv(a, b):
    return -(-a // b)


def _round_up(n, m):
    return ((n + m - 1) // m) * m


def _mlp_kernel(x_ref, w1_ref, b1_ref, w2_ref, b2_ref, w3_ref, b3_ref, o_ref):
    # Hoist bias loads/broadcasts once per body.
    b1 = b1_ref[...]
    b2 = b2_ref[...]
    b3 = b3_ref[...]

    # In-kernel cast to bf16 (MXU-native); avoids a separate wrapper-side XLA pass over x.
    x = x_ref[...].astype(jnp.bfloat16)

    # layer1 + ReLU (bf16 MXU inputs, f32 accumulate + epilogue)
    h1 = jnp.dot(x, w1_ref[...], preferred_element_type=jnp.float32)
    h1 = jnp.maximum(h1 + b1, 0.0).astype(jnp.bfloat16)
    # layer2 + ReLU
    h2 = jnp.dot(h1, w2_ref[...], preferred_element_type=jnp.float32)
    h2 = jnp.maximum(h2 + b2, 0.0)
    # layer3 + Sigmoid (kept fully in f32: K=64, N=4 -> negligible extra MXU cost)
    # TODO(synk): measure-first candidate -- move this tiny matmul off the MXU
    # (VPU broadcast-multiplies + XLU lane reduce) if a bundle dump shows MXU saturation.
    h3 = jnp.dot(h2, w3_ref[...], preferred_element_type=jnp.float32) + b3
    o_ref[...] = jax.nn.sigmoid(h3).astype(o_ref.dtype)


@functools.partial(jax.jit, static_argnames=("tb",))
def pred_twistoffset(x, w1, b1, w2, b2, w3, b3, *, tb=1024):
    """x: (B, in_channel); w_i pre-transposed to (fan_in, fan_out); b_i: (1, fan_out)."""
    B, Cin = x.shape
    H1 = w1.shape[1]       # 256
    H2 = w2.shape[1]       # 64
    Cout = w3.shape[1]     # out_channel
    out_dtype = x.dtype

    assert tb % 8 == 0

    # Tile-count-preserving batch split: pick n_steps first, then shrink the tile to
    # fit so padding is at most 8*n_steps rows.
    n_steps = max(1, _cdiv(B, tb))
    if B >= 256:
        # v7x has 2 TensorCores sharing the ("parallel",) batch axis: keep n_steps >= 2
        # and even so neither TC idles / gets a 2:1 step imbalance. On v5e/v6e this
        # costs at most one extra tiny grid step.
        if n_steps < 2:
            n_steps = 2
        elif n_steps % 2:
            n_steps += 1
    tb_eff = _round_up(_cdiv(B, n_steps), 8)
    Bp = n_steps * tb_eff

    xc = x
    if Bp != B:
        xc = jnp.pad(xc, ((0, Bp - B), (0, 0)))

    # Resident weights: layers 1/2 streamed as bf16 (MXU-native), layer 3 + biases f32.
    w1c = w1.astype(jnp.bfloat16)
    w2c = w2.astype(jnp.bfloat16)
    w3c = w3.astype(jnp.float32)
    b1c = b1.astype(jnp.float32)
    b2c = b2.astype(jnp.float32)
    b3c = b3.astype(jnp.float32)

    x_spec = pl.BlockSpec((tb_eff, Cin), lambda i: (i, 0))
    full = lambda shape: pl.BlockSpec(shape, lambda i: (0, 0))

    x_itemsize = jnp.dtype(xc.dtype).itemsize
    out_itemsize = jnp.dtype(out_dtype).itemsize
    cost = pl.CostEstimate(
        flops=2 * Bp * (Cin * H1 + H1 * H2 + H2 * Cout),
        transcendentals=Bp * Cout,
        bytes_accessed=(Bp * Cin * x_itemsize                     # x (stored dtype)
                        + (Cin * H1 + H1 * H2) * 2                # layer1/2 weights (bf16)
                        + H2 * Cout * 4                           # layer3 weights (f32)
                        + (H1 + H2 + Cout) * 4                    # biases (f32)
                        + Bp * Cout * out_itemsize),              # output
    )

    out = pl.pallas_call(
        _mlp_kernel,
        out_shape=jax.ShapeDtypeStruct((Bp, Cout), out_dtype),
        grid_spec=pltpu.PrefetchScalarGridSpec(
            num_scalar_prefetch=0,
            grid=(n_steps,),
            in_specs=[
                x_spec,                                      # x tile over batch
                full((Cin, H1)), full((1, H1)),              # layer1 params (resident)
                full((H1, H2)),  full((1, H2)),              # layer2 params
                full((H2, Cout)), full((1, Cout)),           # layer3 params
            ],
            out_specs=pl.BlockSpec((tb_eff, Cout), lambda i: (i, 0)),
        ),
        compiler_params=pltpu.CompilerParams(
            dimension_semantics=("parallel",),               # batch axis shards across TCs (v7x)
        ),
        cost_estimate=cost,
    )(xc, w1c, b1c, w2c, b2c, w3c, b3c)

    return out[:B]


def _init_params(key, in_channel, out_channel, dtype=jnp.float32):
    """Deterministic PyTorch-style (Kaiming-uniform-ish) init. Weights stored (fan_in, fan_out)."""
    def linear(k, fan_in, fan_out):
        kw, kb = jax.random.split(k)
        bound = 1.0 / jnp.sqrt(fan_in)
        w = jax.random.uniform(kw, (fan_in, fan_out), dtype, -bound, bound)
        b = jax.random.uniform(kb, (1, fan_out), dtype, -bound, bound)
        return w, b

    k1, k2, k3 = jax.random.split(key, 3)
    w1, b1 = linear(k1, in_channel, 256)
    w2, b2 = linear(k2, 256, 64)
    w3, b3 = linear(k3, 64, out_channel)
    return w1, b1, w2, b2, w3, b3


def _reference(x, w1, b1, w2, b2, w3, b3):
    h = jnp.maximum(x @ w1 + b1, 0.0)
    h = jnp.maximum(h @ w2 + b2, 0.0)
    return jax.nn.sigmoid(h @ w3 + b3)


if __name__ == "__main__":
    in_channel, out_channel = 32, 4

    key = jax.random.PRNGKey(0)
    kx, kp, kx2 = jax.random.split(key, 3)
    params = _init_params(kp, in_channel, out_channel)

    # Small-shape check (single grid step, tile clamped to the 8-aligned batch).
    batch = 8
    x = jax.random.normal(kx, (batch, in_channel), jnp.float32)
    out = jax.block_until_ready(pred_twistoffset(x, *params))
    ref = _reference(x, *params)
    assert out.shape == (batch, out_channel), out.shape
    # bf16 streaming for layers 1/2 -> loosened tolerance vs f32 reference.
    assert jnp.allclose(out, ref, atol=2.5e-2, rtol=2.5e-2), float(jnp.max(jnp.abs(out - ref)))

    # Larger-batch check exercising the multi-step path with even n_steps + minimal padding.
    batch2 = 1030  # awkward B -> n_steps=6, tb_eff=176, only 26 padded rows
    x2 = jax.random.normal(kx2, (batch2, in_channel), jnp.float32)
    out2 = jax.block_until_ready(pred_twistoffset(x2, *params, tb=256))
    ref2 = _reference(x2, *params)
    assert out2.shape == (batch2, out_channel), out2.shape
    assert jnp.allclose(out2, ref2, atol=2.5e-2, rtol=2.5e-2), float(jnp.max(jnp.abs(out2 - ref2)))

    print("KERNEL_OK")
</pallas_src>

<mosaic_0001>
module attributes {stable_mosaic.version = 11 : i64} {
  func.func @_mlp_kernel(%arg0: i32, %arg1: memref<8x32xf32, #tpu.memory_space<vmem>>, %arg2: memref<32x256xbf16, #tpu.memory_space<vmem>>, %arg3: memref<1x256xf32, #tpu.memory_space<vmem>>, %arg4: memref<256x64xbf16, #tpu.memory_space<vmem>>, %arg5: memref<1x64xf32, #tpu.memory_space<vmem>>, %arg6: memref<64x4xf32, #tpu.memory_space<vmem>>, %arg7: memref<1x4xf32, #tpu.memory_space<vmem>>, %arg8: memref<8x4xf32, #tpu.memory_space<vmem>>) attributes {dimension_semantics = [#tpu.dimension_semantics<parallel>], iteration_bounds = array<i64: 1>, scalar_prefetch = 0 : i64, scratch_operands = 0 : i64, tpu.core_type = #tpu.core_type<tc>, window_params = [{transform_indices = @transform_0, window_bounds = array<i64: 8, 32>}, {pipeline_mode = #tpu.pipeline_mode<synchronous>, transform_indices = @transform_1, window_bounds = array<i64: 32, 256>}, {pipeline_mode = #tpu.pipeline_mode<synchronous>, transform_indices = @transform_2, window_bounds = array<i64: 1, 256>}, {pipeline_mode = #tpu.pipeline_mode<synchronous>, transform_indices = @transform_3, window_bounds = array<i64: 256, 64>}, {pipeline_mode = #tpu.pipeline_mode<synchronous>, transform_indices = @transform_4, window_bounds = array<i64: 1, 64>}, {pipeline_mode = #tpu.pipeline_mode<synchronous>, transform_indices = @transform_5, window_bounds = array<i64: 64, 4>}, {pipeline_mode = #tpu.pipeline_mode<synchronous>, transform_indices = @transform_6, window_bounds = array<i64: 1, 4>}, {transform_indices = @transform_7, window_bounds = array<i64: 8, 4>}]} {
    %c0 = arith.constant 0 : index
    %c0_0 = arith.constant 0 : index
    %0 = vector.load %arg3[%c0, %c0_0] : memref<1x256xf32, #tpu.memory_space<vmem>>, vector<1x256xf32>
    %c0_1 = arith.constant 0 : index
    %c0_2 = arith.constant 0 : index
    %1 = vector.load %arg5[%c0_1, %c0_2] : memref<1x64xf32, #tpu.memory_space<vmem>>, vector<1x64xf32>
    %c0_3 = arith.constant 0 : index
    %c0_4 = arith.constant 0 : index
    %2 = vector.load %arg7[%c0_3, %c0_4] : memref<1x4xf32, #tpu.memory_space<vmem>>, vector<1x4xf32>
    %c0_5 = arith.constant 0 : index
    %c0_6 = arith.constant 0 : index
    %3 = vector.load %arg1[%c0_5, %c0_6] : memref<8x32xf32, #tpu.memory_space<vmem>>, vector<8x32xf32>
    %4 = arith.truncf %3 : vector<8x32xf32> to vector<8x32xbf16>
    %c0_7 = arith.constant 0 : index
    %c0_8 = arith.constant 0 : index
    %5 = vector.load %arg2[%c0_7, %c0_8] : memref<32x256xbf16, #tpu.memory_space<vmem>>, vector<32x256xbf16>
    %cst = arith.constant dense<0.000000e+00> : vector<8x256xf32>
    %6 = tpu.matmul %4, %5, %cst {dimension_numbers = #tpu.dot_dimension_numbers<[1], [0], [0], [1], [0, 0, 1, 1], [], []>} : vector<8x32xbf16>, vector<32x256xbf16>, vector<8x256xf32> -> vector<8x256xf32>
    %7 = vector.broadcast %0 : vector<1x256xf32> to vector<8x256xf32>
    %8 = arith.addf %6, %7 : vector<8x256xf32>
    %cst_9 = arith.constant 0.000000e+00 : f32
    %9 = vector.broadcast %cst_9 : f32 to vector<8x256xf32>
    %10 = arith.maximumf %8, %9 : vector<8x256xf32>
    %11 = arith.truncf %10 : vector<8x256xf32> to vector<8x256xbf16>
    %c0_10 = arith.constant 0 : index
    %c0_11 = arith.constant 0 : index
    %12 = vector.load %arg4[%c0_10, %c0_11] : memref<256x64xbf16, #tpu.memory_space<vmem>>, vector<256x64xbf16>
    %cst_12 = arith.constant dense<0.000000e+00> : vector<8x64xf32>
    %13 = tpu.matmul %11, %12, %cst_12 {dimension_numbers = #tpu.dot_dimension_numbers<[1], [0], [0], [1], [0, 0, 1, 1], [], []>} : vector<8x256xbf16>, vector<256x64xbf16>, vector<8x64xf32> -> vector<8x64xf32>
    %14 = vector.broadcast %1 : vector<1x64xf32> to vector<8x64xf32>
    %15 = arith.addf %13, %14 : vector<8x64xf32>
    %cst_13 = arith.constant 0.000000e+00 : f32
    %16 = vector.broadcast %cst_13 : f32 to vector<8x64xf32>
    %17 = arith.maximumf %15, %16 : vector<8x64xf32>
    %c0_14 = arith.constant 0 : index
    %c0_15 = arith.constant 0 : index
    %18 = vector.load %arg6[%c0_14, %c0_15] : memref<64x4xf32, #tpu.memory_space<vmem>>, vector<64x4xf32>
    %cst_16 = arith.constant dense<0.000000e+00> : vector<8x4xf32>
    %19 = tpu.matmul %17, %18, %cst_16 {dimension_numbers = #tpu.dot_dimension_numbers<[1], [0], [0], [1], [0, 0, 1, 1], [], []>} : vector<8x64xf32>, vector<64x4xf32>, vector<8x4xf32> -> vector<8x4xf32>
    %20 = vector.broadcast %2 : vector<1x4xf32> to vector<8x4xf32>
    %21 = arith.addf %19, %20 : vector<8x4xf32>
    %22 = arith.negf %21 : vector<8x4xf32>
    %23 = math.exp %22 : vector<8x4xf32>
    %cst_17 = arith.constant 1.000000e+00 : f32
    %24 = vector.broadcast %cst_17 : f32 to vector<8x4xf32>
    %25 = arith.addf %24, %23 : vector<8x4xf32>
    %26 = arith.divf %24, %25 : vector<8x4xf32>
    %c0_18 = arith.constant 0 : index
    %c0_19 = arith.constant 0 : index
    %27 = vector.load %arg8[%c0_18, %c0_19] : memref<8x4xf32, #tpu.memory_space<vmem>>, vector<8x4xf32>
    tpu.vector_store %arg8[%c0_18, %c0_19], %26 {strides = array<i32>} : memref<8x4xf32, #tpu.memory_space<vmem>>, vector<8x4xf32>,
    return
  }
  func.func @transform_0(%arg0: i32) -> (i32, i32) {
    %c0_i32 = arith.constant 0 : i32
    %c0_i32_0 = arith.constant 0 : i32
    return %arg0, %c0_i32 : i32, i32
  }
  func.func @transform_1(%arg0: i32) -> (i32, i32) {
    %c0_i32 = arith.constant 0 : i32
    %c0_i32_0 = arith.constant 0 : i32
    %c0_i32_1 = arith.constant 0 : i32
    return %c0_i32, %c0_i32_0 : i32, i32
  }
  func.func @transform_2(%arg0: i32) -> (i32, i32) {
    %c0_i32 = arith.constant 0 : i32
    %c0_i32_0 = arith.constant 0 : i32
    %c0_i32_1 = arith.constant 0 : i32
    return %c0_i32, %c0_i32_0 : i32, i32
  }
  func.func @transform_3(%arg0: i32) -> (i32, i32) {
    %c0_i32 = arith.constant 0 : i32
    %c0_i32_0 = arith.constant 0 : i32
    %c0_i32_1 = arith.constant 0 : i32
    return %c0_i32, %c0_i32_0 : i32, i32
  }
  func.func @transform_4(%arg0: i32) -> (i32, i32) {
    %c0_i32 = arith.constant 0 : i32
    %c0_i32_0 = arith.constant 0 : i32
    %c0_i32_1 = arith.constant 0 : i32
    return %c0_i32, %c0_i32_0 : i32, i32
  }
  func.func @transform_5(%arg0: i32) -> (i32, i32) {
    %c0_i32 = arith.constant 0 : i32
    %c0_i32_0 = arith.constant 0 : i32
    %c0_i32_1 = arith.constant 0 : i32
    return %c0_i32, %c0_i32_0 : i32, i32
  }
  func.func @transform_6(%arg0: i32) -> (i32, i32) {
    %c0_i32 = arith.constant 0 : i32
    %c0_i32_0 = arith.constant 0 : i32
    %c0_i32_1 = arith.constant 0 : i32
    return %c0_i32, %c0_i32_0 : i32, i32
  }
  func.func @transform_7(%arg0: i32) -> (i32, i32) {
    %c0_i32 = arith.constant 0 : i32
    %c0_i32_0 = arith.constant 0 : i32
    return %arg0, %c0_i32 : i32, i32
  }
}

</mosaic_0001>

<bundles_post_ra>
// kernel: pred_twistoffset.1
= control target key start
LH: loop header
LB: loop body
LE: loop exit
PB: predicated region body
PF: predicated region fallthrough
CT: control target
= control target key end

     0   :  { %vm61_vm0 = vcmask 261120   ;;  %vm264_vm1 = vcmask 523264   ;;  %vm307_vm5 = vcmask 31744   ;;  %s574_s1 = inlined_call_operand.vmem [shape: bf16[32,256], index: 1, kind: input, shape index: {}]   ;;  %s575_s0 = inlined_call_operand.vmem [shape: f32[8,32], index: 0, kind: input, shape index: {}]   ;;  %s576_s3 = inlined_call_operand.vmem [shape: bf16[256,64], index: 3, kind: input, shape index: {}]   ;;  %s577_s4 = inlined_call_operand.vmem [shape: f32[1,64], index: 4, kind: input, shape index: {}]   ;;  %s578_s5 = inlined_call_operand.vmem [shape: f32[64,4], index: 5, kind: input, shape index: {}]   ;;  %s579_s2 = inlined_call_operand.vmem [shape: f32[1,256], index: 2, kind: input, shape index: {}]   ;;  %s580_s6 = inlined_call_operand.vmem [shape: f32[1,4], index: 6, kind: input, shape index: {}]   ;;  %s581_s7 = inlined_call_operand.vmem [shape: f32[8,4], index: 7, kind: output, shape index: {}]  }
   0x1   :  { %v323_v0 = vld [vmem:[%s574_s1 + $0x10] sm:$0xf]  ;;  %v400_v1 = vld [vmem:[%s574_s1 + $0x14] sm:$0xf0]  ;;  %v399_v2 = vld [vmem:[%s574_s1 + $0x14] sm:$0xf] }
   0x2   :  { %v324_v3 = vor.u32 %v400_v1, %v323_v0  ;;  %v325_v4 = vld [vmem:[%s574_s1 + $0x18] sm:$0xf0]  ;;  %v315_v5 = vld [vmem:[%s574_s1] sm:$0xf]  ;;  %v398_v6 = vld [vmem:[%s574_s1 + $0x4] sm:$0xf0] }
   0x3   :  { %v328_v7 = vor.u32 %v399_v2, %v325_v4  ;;  %v397_v8 = vld [vmem:[%s574_s1 + $0x4] sm:$0xf]  ;;  %v317_v9 = vld [vmem:[%s574_s1 + $0x8] sm:$0xf0]  ;;  %v316_v10 = vor.u32 %v398_v6, %v315_v5  ;;  %v408_v12 = vld [vmem:[%s576_s3 + $0x38] sm:$0xff] }
   0x4   :  { %71 = vmatpush.bf16.msra.mxu0 %v324_v3  ;;  %v30_v11 = vld [vmem:[%s575_s0] sm:$0xff]  ;;  %v416_v13 = vld [vmem:[%s576_s3 + $0x78] sm:$0xff]  ;;  %v320_v14 = vor.u32 %v397_v8, %v317_v9  ;;  %226 = vmatpush.bf16.msra.mxu2 %v408_v12  ;;  %v407_v15 = vld [vmem:[%s576_s3 + $0x30] sm:$0xff] }
   0x5   :  { %84 = vmatpush.bf16.msra.mxu1 %v328_v7  ;;  %239 = vmatpush.bf16.msra.mxu3 %v416_v13  ;;  %v415_v16 = vld [vmem:[%s576_s3 + $0x70] sm:$0xff]  ;;  %v31_v17 = vpack.c.bf16 %v30_v11, %v30_v11  ;;  %v406_v18 = vld [vmem:[%s576_s3 + $0x28] sm:$0xff]  ;;  %v405_v20 = vld [vmem:[%s576_s3 + $0x20] sm:$0xff] }
   0x6   :  { %v414_v19 = vld [vmem:[%s576_s3 + $0x68] sm:$0xff]  ;;  %v413_v21 = vld [vmem:[%s576_s3 + $0x60] sm:$0xff]  ;;  %v404_v22 = vld [vmem:[%s576_s3 + $0x18] sm:$0xff] }
   0x7   :  { %v412_v23 = vld [vmem:[%s576_s3 + $0x58] sm:$0xff]  ;;  %v403_v24 = vld [vmem:[%s576_s3 + $0x10] sm:$0xff]  ;;  %v402_v26 = vld [vmem:[%s576_s3 + $0x8] sm:$0xff] }
   0x8   :  { %72 = vmatpush.bf16.msra.mxu0 %v316_v10  ;;  %227 = vmatpush.bf16.msra.mxu2 %v407_v15  ;;  %v411_v25 = vld [vmem:[%s576_s3 + $0x50] sm:$0xff]  ;;  %v410_v27 = vld [vmem:[%s576_s3 + $0x48] sm:$0xff]  ;;  %v401_v28 = vld [vmem:[%s576_s3] sm:$0xff] }
   0x9   :  { %85 = vmatpush.bf16.msra.mxu1 %v320_v14  ;;  %240 = vmatpush.bf16.msra.mxu3 %v415_v16  ;;  %v409_v29 = vld [vmem:[%s576_s3 + $0x40] sm:$0xff]  ;;  %v260_v30 = vld [vmem:[%s578_s5 + $0x38] sm:$0xff]  ;;  %v259_v31 = vld [vmem:[%s578_s5 + $0x30] sm:$0xff] }
   0xa   :  { %v258_v32 = vld [vmem:[%s578_s5 + $0x28] sm:$0xff]  ;;  %v257_v33 = vld [vmem:[%s578_s5 + $0x20] sm:$0xff]  ;;  %v256_v34 = vld [vmem:[%s578_s5 + $0x18] sm:$0xff] }
   0xb   :  { %329 = vmatmul.msk.bf16.vlgmr.msra.gmra.mxu0 %vm61_vm0, %v31_v17  ;;  %v27_v35 = vld [vmem:[%s579_s2] sm:$0x3]  ;;  %v255_v48 = vld [vmem:[%s578_s5 + $0x10] sm:$0xff]  ;;  %v254_v49 = vld [vmem:[%s578_s5 + $0x8] sm:$0xff] }
   0xc   :  { %330 = vmatmul.msk.bf16.vlgmr.msra.gmra.mxu1 %vm61_vm0, %v31_v17  ;;  %228 = vmatpush.bf16.msra.mxu2 %v406_v18  ;;  %v37_v36 = vperm.slane %v27_v35, 0  ;;  %v38_v37 = vperm.slane %v27_v35, 1  ;;  %v253_v50 = vld [vmem:[%s578_s5] sm:$0xff] }
   0xd   :  { %241 = vmatpush.bf16.msra.mxu3 %v414_v19  ;;  %276 = vmatpush.msrb.mxu0 %v260_v30  ;;  %v417_v51 = vld [vmem:[%s577_s4] ss:$0 sm:$0xff] }
   0xe   :  { %v418_v59 = vld [vmem:[%s580_s6] ss:$0 sm:$0xff] }
   0xf   :  { %277 = vmatpush.msrb.mxu0 %v259_v31 }
  0x10   :  { %229 = vmatpush.bf16.msra.mxu2 %v405_v20 }
  0x11   :  { %242 = vmatpush.bf16.msra.mxu3 %v413_v21  ;;  %278 = vmatpush.msrb.mxu0 %v258_v32 }
  0x13   :  { %279 = vmatpush.msrb.mxu0 %v257_v33 }
  0x14   :  { %230 = vmatpush.bf16.msra.mxu2 %v404_v22 }
  0x15   :  { %243 = vmatpush.bf16.msra.mxu3 %v412_v23  ;;  %280 = vmatpush.msrb.mxu0 %v256_v34 }
  0x17   :  { %281 = vmatpush.msrb.mxu0 %v255_v48 }
  0x18   :  { %231 = vmatpush.bf16.msra.mxu2 %v403_v24 }
  0x19   :  { %244 = vmatpush.bf16.msra.mxu3 %v411_v25  ;;  %282 = vmatpush.msrb.mxu0 %v254_v49 }
  0x1b   :  { %283 = vmatpush.msrb.mxu0 %v253_v50 }
  0x1c   :  { %232 = vmatpush.bf16.msra.mxu2 %v402_v26 }
  0x1d   :  { %245 = vmatpush.bf16.msra.mxu3 %v410_v27 }
  0x20   :  { %233 = vmatpush.bf16.msra.mxu2 %v401_v28 }
  0x21   :  { %246 = vmatpush.bf16.msra.mxu3 %v409_v29 }
  0x88   :  { %v74_v38 = vpop.f32.mrf.mxu0 }
  0x89   :  { %v75_v39 = vadd.f32 %v74_v38, %v37_v36  ;;  %v87_v40 = vpop.f32.mrf.mxu1 }
  0x8a   :  { %v88_v41 = vadd.f32 %v87_v40, %v38_v37 }
  0x8b   :  { %v91_v42 = vmax.f32 %v75_v39, 0.0 }
  0x8c   :  { %v92_v43 = vmax.f32 %v88_v41, 0.0 }
  0x8d   :  { %v93_v44 = vpack.c.bf16 %v91_v42, %v91_v42 }
  0x8e   :  { %v94_v45 = vpack.c.bf16 %v92_v43, %v92_v43 }
  0x8f   :  { %234 = vmatmul.bf16.vlgmr.msra.gmra.mxu2 %v93_v44 }
  0x90   :  { %247 = vmatmul.bf16.vlgmr.msra.gmra.mxu3 %v94_v45  ;;  %v76_v46 = vpop.f32.mrf.mxu0 }
  0x91   :  { %v89_v47 = vpop.f32.mrf.mxu1 }
 0x112   :  { %v235_v52 = vpop.f32.mrf.mxu2 }
 0x113   :  { %v236_v53 = vadd.f32 %v417_v51, %v235_v52  ;;  %v248_v54 = vpop.f32.mrf.mxu3 }
 0x115   :  { %v249_v55 = vadd.f32 %v248_v54, %v236_v53 }
 0x117   :  { %v252_v56 = vmax.f32 %v249_v55, 0.0 }
 0x119   :  { %395 = vmatmul.msk.f32.vlgmr.msrb.gmra.mxu0 %vm264_vm1, %v252_v56 }
 0x11a   :  { %v237_v57 = vpop.f32.mrf.mxu2 }
 0x11b   :  { %v250_v58 = vpop.f32.mrf.mxu3 }
 0x196   :  { %v285_v60 = vpop.f32.mrf.mxu0 }
 0x197   :  { %v286_v61 = vadd.f32 %v418_v59, %v285_v60 }
 0x199   :  { %v396_v62 = vmul.f32 -1.442695, %v286_v61 }
 0x19b   :  { %419 = vpow2.f32 %v396_v62 }
 0x1a1   :  { %v420_v63 = vpop.eup %419 }
 0x1a2   :  { %v291_v0 = vadd.f32 1.0, %v420_v63 }
 0x1a4   :  { %421 = vrcp.f32 %v291_v0  ;;  %v303_v4 = vand.u32 2147483648, %v291_v0  ;;  %v301_v6 = vand.u32 2147483647, %v291_v0  ;;  %vm297_vm3 = vweird.f32 %v291_v0 }
 0x1a6   :  { %v304_v8 = vor.u32 1.1754944e-38, %v303_v4  ;;  %vm302_vm6 = vcmp.eq.f32.partialorder %v301_v6, 8.507059e+37 }
 0x1aa   :  { %v422_v1 = vpop.eup %421 }
 0x1ab   :  { %v293_v2 = vmul.f32 %v422_v1, %v291_v0  ;;  %vm298_vm2 = vweird.f32 %v422_v1 }
 0x1ac   :  { %vm299_vm4 = vmor %vm297_vm3, %vm298_vm2 }
 0x1ad   :  { %v294_v3 = vsub.f32 1.0, %v293_v2 }
 0x1af   :  { %v295_v5 = vmul.f32 %v422_v1, %v294_v3 }
 0x1b1   :  { %v296_v7 = vadd.f32 %v422_v1, %v295_v5 }
 0x1b3   :  { %v300_v9 = vsel %vm299_vm4, %v422_v1, %v296_v7 }
 0x1b4   :  { %v305_v10 = vsel %vm302_vm6, %v304_v8, %v300_v9 }
 0x1b5   :  { %308 = vst.msk [vmem:[%s581_s7] sm:$0xff] %vm307_vm5, %v305_v10 }

</bundles_post_ra>
